<compile_context>
chip_gen: v7x
topology: tpu7x:2x2x1
jax: 0.10.0
libtpu: 0.0.40
codegen_flags: <defaults>
</compile_context>

<pallas_src>
import jax
import jax.numpy as jnp
from jax.experimental import pallas as pl
from jax.experimental.pallas import tpu as pltpu


def _gelu(x):
    # tanh-approximate GELU (see TODO above re: exact erf form).
    c = jnp.asarray(0.7978845608028654, x.dtype)  # sqrt(2/pi)
    return 0.5 * x * (1.0 + jnp.tanh(c * (x + 0.044715 * x * x * x)))


def fold_params(p, in_features):
    """One-time param prep: transpose / fold / pack everything the kernel uses."""
    total = sum(in_features)
    n_fields = len(in_features)
    emb_dim = p["emb_table"].shape[1]
    hi = jax.lax.Precision.HIGHEST

    total_pad = 128 * pl.cdiv(total, 128)          # lane-align the table
    aug_rows = 8 * pl.cdiv(emb_dim + 1, 8)         # sublane-align emb rows + lin row

    # Augmented transposed table: rows 0..H-1 = emb_table^T, row H = linear
    # weights (so the linear term comes for free out of the gather matmul).
    embt_aug = jnp.zeros((aug_rows, total_pad), jnp.float32)
    embt_aug = embt_aug.at[:emb_dim, :total].set(p["emb_table"].T)
    embt_aug = embt_aug.at[emb_dim, :total].set(p["lin_table"][:, 0])

    # Activation-free linear pairs folded at HIGHEST precision (one-time cost).
    w23 = jnp.dot(p["w2"], p["w3"], precision=hi)                 # (D, H)
    b23 = jnp.dot(p["b2"], p["w3"], precision=hi) + p["b3"]       # (1, H)
    w45 = jnp.dot(p["w4"], p["w5"], precision=hi)                 # (H, 1)
    b45 = jnp.dot(p["b4"], p["w5"], precision=hi) + p["b5"]       # (1, 1)
    const = b45 + p["lin_bias"].reshape(1, 1)                     # (1, 1)

    # Packed bias/constant column: [b1 | b23 | w45 | const] -> (D + 2H + 1, 1)
    cols = jnp.concatenate([p["b1"].T, b23.T, w45, const], axis=0)

    offsets, acc = [], 0
    for n in in_features:
        offsets.append(acc)
        acc += n

    return dict(
        offsets=tuple(offsets),        # static python ints, baked into kernel
        n_fields=n_fields,
        emb_dim=emb_dim,
        embt_aug=embt_aug,             # (H_pad, Tp)
        w1t=p["w1"].T,                 # (D, D)
        w23t=w23.T,                    # (H, D)
        cols=cols,                     # (D + 2H + 1, 1)
    )


def deepfm_forward(x, fp, *, block_b=1024):
    """x: (B, F) integer field indices. Returns (B,) float32 probabilities."""
    B, n_fields = x.shape
    assert n_fields == fp["n_fields"]
    emb_dim = fp["emb_dim"]
    offsets = fp["offsets"]
    D = n_fields * emb_dim
    aug_rows, total_pad = fp["embt_aug"].shape
    n_cols = fp["cols"].shape[0]

    # Batch tile: lane-dense multiple of 128, large to amortize per-step
    # overhead, capped so the grid keeps >= 2 steps (megacore on v7x).
    half = 128 * pl.cdiv(B, 2 * 128)
    bt = max(128, (min(block_b, half) // 128) * 128)
    b_pad = bt * pl.cdiv(B, bt)
    grid = (b_pad // bt,)

    # Single fused pad+transpose+cast pass over the index matrix; field axis
    # padded to 8 sublanes so the per-step index DMA is an aligned tile.
    f_pad = 8 * pl.cdiv(n_fields, 8)
    idx_t = jnp.pad(x.astype(jnp.int32).T,
                    ((0, f_pad - n_fields), (0, b_pad - B)))       # (8, B_pad)

    def kernel(idx_ref, embt_ref, w1t_ref, w23t_ref, cols_ref, out_ref):
        # idx_ref : (8, bt)        int32  raw field values (offsets added here)
        # embt_ref: (H_pad, Tp)    f32    emb table^T, row H = linear weights
        # w1t_ref : (D, D)         f32    w1^T (single first-layer matmul)
        # w23t_ref: (H, D)         f32    (w2 @ w3)^T  (no act between them)
        # cols_ref: (D+2H+1, 1)    f32    [b1 | b2@w3+b3 | w4@w5 | b4@w5+b5+lin_b]
        # out_ref : (1, bt)        f32    sigmoid output row (lane-dense store)
        bt_ = out_ref.shape[1]
        embt = embt_ref[...]                                           # (H_pad, Tp)
        row_ids = jax.lax.broadcasted_iota(jnp.int32, (total_pad, bt_), 0)

        blocks = []
        lin = jnp.zeros((1, bt_), jnp.float32)
        # Static unroll over the (few) categorical fields.
        for f in range(n_fields):
            one_hot = (row_ids == idx_ref[f:f + 1, :] + offsets[f]
                       ).astype(jnp.float32)                          # (Tp, bt)
            # Exact gather of emb row AND linear weight in one MXU matmul.
            ef = jnp.dot(embt, one_hot,
                         preferred_element_type=jnp.float32)          # (H_pad, bt)
            blocks.append(ef[:emb_dim, :])                            # (H, bt)
            lin = lin + ef[emb_dim:emb_dim + 1, :]                    # (1, bt)

        # Sublane-stacked embedding, row order matches torch .view(B, F*H).
        emb = jnp.concatenate(blocks, axis=0)                         # (D, bt)

        # FactorizationMachine (reduce_sum=True): derived from the stack.
        sum_f = blocks[0]
        for f in range(1, n_fields):
            sum_f = sum_f + blocks[f]                                 # (H, bt)
        fm = 0.5 * (jnp.sum(sum_f * sum_f, axis=0, keepdims=True)
                    - jnp.sum(emb * emb, axis=0, keepdims=True))      # (1, bt)

        # Unpack the constant column (static, sublane-aligned slices).
        b1 = cols_ref[0:D, :]                                         # (D, 1)
        b23 = cols_ref[D:D + emb_dim, :]                              # (H, 1)
        w45 = cols_ref[D + emb_dim:D + 2 * emb_dim, :]                # (H, 1)
        c = cols_ref[D + 2 * emb_dim:D + 2 * emb_dim + 1, :]          # (1, 1)

        # MLP (dropout = identity; fc2a/fc1b and fc2b/final folded offline).
        h1 = jnp.dot(w1t_ref[...], emb,
                     preferred_element_type=jnp.float32)              # (D, bt)
        a1 = _gelu(h1 + b1)
        a3 = _gelu(jnp.dot(w23t_ref[...], a1,
                           preferred_element_type=jnp.float32) + b23) # (H, bt)
        mlp = jnp.sum(a3 * w45, axis=0, keepdims=True)                # (1, bt)

        out_ref[...] = jax.nn.sigmoid(lin + fm + mlp + c)

    const2 = lambda i: (0, 0)
    out = pl.pallas_call(
        kernel,
        out_shape=jax.ShapeDtypeStruct((1, b_pad), jnp.float32),
        grid=grid,
        in_specs=[
            pl.BlockSpec((f_pad, bt), lambda i: (0, i)),          # indices (streamed)
            pl.BlockSpec((aug_rows, total_pad), const2),          # emb+lin table
            pl.BlockSpec((D, D), const2),                         # w1^T
            pl.BlockSpec((emb_dim, D), const2),                   # (w2@w3)^T
            pl.BlockSpec((n_cols, 1), const2),                    # packed constants
        ],
        out_specs=pl.BlockSpec((1, bt), lambda i: (0, i)),
        compiler_params=pltpu.CompilerParams(
            dimension_semantics=("parallel",),        # megacore on v7x
            vmem_limit_bytes=32 * 1024 * 1024,        # safe on v5e/v6e/v7x
        ),
    )(idx_t, fp["embt_aug"], fp["w1t"], fp["w23t"], fp["cols"])

    return out[0, :B]                                  # drop padding, squeeze(1)


def reference_forward(x, p):
    """Pure-JAX reference: torch op ordering, unfolded weights."""
    B, n_fields = x.shape
    emb_dim = p["emb_table"].shape[1]
    hi = jax.lax.Precision.HIGHEST
    idx = x + p["offsets"][None, :]
    emb = p["emb_table"][idx]                                        # (B, F, H)
    linear = jnp.sum(p["lin_table"][idx][..., 0], axis=1, keepdims=True) + p["lin_bias"]
    sum_f = jnp.sum(emb, axis=1)
    fm = 0.5 * jnp.sum(sum_f * sum_f - jnp.sum(emb * emb, axis=1), axis=-1, keepdims=True)
    h = emb.reshape(B, n_fields * emb_dim)
    h = _gelu(jnp.dot(h, p["w1"], precision=hi) + p["b1"])
    h = jnp.dot(h, p["w2"], precision=hi) + p["b2"]
    h = _gelu(jnp.dot(h, p["w3"], precision=hi) + p["b3"])
    h = jnp.dot(h, p["w4"], precision=hi) + p["b4"]
    mlp_out = jnp.dot(h, p["w5"], precision=hi) + p["b5"]
    return jax.nn.sigmoid(linear + fm + mlp_out)[:, 0]


def init_params(key, in_features, hidden):
    total = sum(in_features)
    n_fields = len(in_features)
    D = n_fields * hidden                                 # deep_fm_embedding_size
    ks = jax.random.split(key, 8)

    def w(k, shape, scale=0.1):
        return jax.random.normal(k, shape, jnp.float32) * scale

    offsets = [0]
    for n in in_features[:-1]:
        offsets.append(offsets[-1] + n)

    return dict(
        offsets=jnp.asarray(offsets, jnp.int32),
        emb_table=w(ks[0], (total, hidden)),              # FeaturesEmbedding
        lin_table=w(ks[1], (total, 1)),                   # FeaturesLinear weight
        lin_bias=jnp.zeros((1,), jnp.float32),            # FeaturesLinear bias
        # Mlp #1: fc1 (D -> D), fc2 (D -> hidden)
        w1=w(ks[2], (D, D)), b1=jnp.zeros((1, D), jnp.float32),
        w2=w(ks[3], (D, hidden)), b2=jnp.zeros((1, hidden), jnp.float32),
        # Mlp #2: fc1 (hidden -> hidden), fc2 (hidden -> hidden)
        w3=w(ks[4], (hidden, hidden)), b3=jnp.zeros((1, hidden), jnp.float32),
        w4=w(ks[5], (hidden, hidden)), b4=jnp.zeros((1, hidden), jnp.float32),
        # Final Linear(hidden -> 1)
        w5=w(ks[6], (hidden, 1)), b5=jnp.zeros((1, 1), jnp.float32),
    )


if __name__ == "__main__":
    in_features = [3, 5, 7, 4]      # 4 categorical fields
    hidden_features = 16
    batch = 8

    key = jax.random.PRNGKey(0)
    pkey, xkey = jax.random.split(key)
    params = init_params(pkey, in_features, hidden_features)
    folded = fold_params(params, in_features)

    cols = [jax.random.randint(jax.random.fold_in(xkey, i), (batch,), 0, n, dtype=jnp.int32)
            for i, n in enumerate(in_features)]
    x = jnp.stack(cols, axis=1)     # (B, F) int32

    out = jax.block_until_ready(deepfm_forward(x, folded))
    ref = jax.block_until_ready(reference_forward(x, params))
    assert out.shape == (batch,), out.shape
    assert jnp.all(jnp.isfinite(out))
    assert jnp.allclose(out, ref, atol=2e-5, rtol=2e-5), (out, ref)

    # Multi-block path: exercises the batch grid (>= 2 steps), padding, and
    # the "parallel" batch axis.
    batch2 = 300
    cols2 = [jax.random.randint(jax.random.fold_in(xkey, 100 + i), (batch2,), 0, n,
                                dtype=jnp.int32)
             for i, n in enumerate(in_features)]
    x2 = jnp.stack(cols2, axis=1)
    out2 = jax.block_until_ready(deepfm_forward(x2, folded))
    ref2 = jax.block_until_ready(reference_forward(x2, params))
    assert out2.shape == (batch2,)
    assert jnp.allclose(out2, ref2, atol=2e-5, rtol=2e-5)

    print("KERNEL_OK")
</pallas_src>

<mosaic_0001>
module attributes {stable_mosaic.version = 11 : i64} {
  func.func @kernel(%arg0: i32, %arg1: memref<8x128xi32, #tpu.memory_space<vmem>>, %arg2: memref<24x128xf32, #tpu.memory_space<vmem>>, %arg3: memref<64x64xf32, #tpu.memory_space<vmem>>, %arg4: memref<16x64xf32, #tpu.memory_space<vmem>>, %arg5: memref<97x1xf32, #tpu.memory_space<vmem>>, %arg6: memref<1x128xf32, #tpu.memory_space<vmem>>) attributes {dimension_semantics = [#tpu.dimension_semantics<parallel>], iteration_bounds = array<i64: 1>, scalar_prefetch = 0 : i64, scratch_operands = 0 : i64, tpu.core_type = #tpu.core_type<tc>, window_params = [{transform_indices = @transform_0, window_bounds = array<i64: 8, 128>}, {pipeline_mode = #tpu.pipeline_mode<synchronous>, transform_indices = @transform_1, window_bounds = array<i64: 24, 128>}, {pipeline_mode = #tpu.pipeline_mode<synchronous>, transform_indices = @transform_2, window_bounds = array<i64: 64, 64>}, {pipeline_mode = #tpu.pipeline_mode<synchronous>, transform_indices = @transform_3, window_bounds = array<i64: 16, 64>}, {pipeline_mode = #tpu.pipeline_mode<synchronous>, transform_indices = @transform_4, window_bounds = array<i64: 97, 1>}, {transform_indices = @transform_5, window_bounds = array<i64: 1, 128>}]} {
    %c0 = arith.constant 0 : index
    %c0_0 = arith.constant 0 : index
    %0 = vector.load %arg2[%c0, %c0_0] : memref<24x128xf32, #tpu.memory_space<vmem>>, vector<24x128xf32>
    %1 = tpu.iota {dimensions = array<i32: 0>} : vector<128x128xi32>
    %cst = arith.constant 0.000000e+00 : f32
    %2 = vector.broadcast %cst : f32 to vector<1x128xf32>
    %c0_1 = arith.constant 0 : index
    %c0_2 = arith.constant 0 : index
    %3 = vector.load %arg1[%c0_1, %c0_2] : memref<8x128xi32, #tpu.memory_space<vmem>>, vector<1x128xi32>
    %c0_i32 = arith.constant 0 : i32
    %4 = vector.broadcast %c0_i32 : i32 to vector<1x128xi32>
    %5 = arith.addi %3, %4 : vector<1x128xi32>
    %6 = vector.broadcast %5 : vector<1x128xi32> to vector<128x128xi32>
    %7 = arith.cmpi eq, %1, %6 : vector<128x128xi32>
    %8 = arith.extui %7 : vector<128x128xi1> to vector<128x128xi32>
    %9 = arith.sitofp %8 : vector<128x128xi32> to vector<128x128xf32>
    %cst_3 = arith.constant dense<0.000000e+00> : vector<24x128xf32>
    %10 = tpu.matmul %0, %9, %cst_3 {dimension_numbers = #tpu.dot_dimension_numbers<[1], [0], [0], [1], [0, 0, 1, 1], [], []>} : vector<24x128xf32>, vector<128x128xf32>, vector<24x128xf32> -> vector<24x128xf32>
    %11 = vector.extract_strided_slice %10 {offsets = [0, 0], sizes = [16, 128], strides = [1, 1]} : vector<24x128xf32> to vector<16x128xf32>
    %12 = vector.extract_strided_slice %10 {offsets = [16, 0], sizes = [1, 128], strides = [1, 1]} : vector<24x128xf32> to vector<1x128xf32>
    %13 = arith.addf %2, %12 : vector<1x128xf32>
    %c1 = arith.constant 1 : index
    %c0_4 = arith.constant 0 : index
    %14 = vector.load %arg1[%c1, %c0_4] : memref<8x128xi32, #tpu.memory_space<vmem>>, vector<1x128xi32>
    %c3_i32 = arith.constant 3 : i32
    %15 = vector.broadcast %c3_i32 : i32 to vector<1x128xi32>
    %16 = arith.addi %14, %15 : vector<1x128xi32>
    %17 = vector.broadcast %16 : vector<1x128xi32> to vector<128x128xi32>
    %18 = arith.cmpi eq, %1, %17 : vector<128x128xi32>
    %19 = arith.extui %18 : vector<128x128xi1> to vector<128x128xi32>
    %20 = arith.sitofp %19 : vector<128x128xi32> to vector<128x128xf32>
    %cst_5 = arith.constant dense<0.000000e+00> : vector<24x128xf32>
    %21 = tpu.matmul %0, %20, %cst_5 {dimension_numbers = #tpu.dot_dimension_numbers<[1], [0], [0], [1], [0, 0, 1, 1], [], []>} : vector<24x128xf32>, vector<128x128xf32>, vector<24x128xf32> -> vector<24x128xf32>
    %22 = vector.extract_strided_slice %21 {offsets = [0, 0], sizes = [16, 128], strides = [1, 1]} : vector<24x128xf32> to vector<16x128xf32>
    %23 = vector.extract_strided_slice %21 {offsets = [16, 0], sizes = [1, 128], strides = [1, 1]} : vector<24x128xf32> to vector<1x128xf32>
    %24 = arith.addf %13, %23 : vector<1x128xf32>
    %c2 = arith.constant 2 : index
    %c0_6 = arith.constant 0 : index
    %25 = vector.load %arg1[%c2, %c0_6] : memref<8x128xi32, #tpu.memory_space<vmem>>, vector<1x128xi32>
    %c8_i32 = arith.constant 8 : i32
    %26 = vector.broadcast %c8_i32 : i32 to vector<1x128xi32>
    %27 = arith.addi %25, %26 : vector<1x128xi32>
    %28 = vector.broadcast %27 : vector<1x128xi32> to vector<128x128xi32>
    %29 = arith.cmpi eq, %1, %28 : vector<128x128xi32>
    %30 = arith.extui %29 : vector<128x128xi1> to vector<128x128xi32>
    %31 = arith.sitofp %30 : vector<128x128xi32> to vector<128x128xf32>
    %cst_7 = arith.constant dense<0.000000e+00> : vector<24x128xf32>
    %32 = tpu.matmul %0, %31, %cst_7 {dimension_numbers = #tpu.dot_dimension_numbers<[1], [0], [0], [1], [0, 0, 1, 1], [], []>} : vector<24x128xf32>, vector<128x128xf32>, vector<24x128xf32> -> vector<24x128xf32>
    %33 = vector.extract_strided_slice %32 {offsets = [0, 0], sizes = [16, 128], strides = [1, 1]} : vector<24x128xf32> to vector<16x128xf32>
    %34 = vector.extract_strided_slice %32 {offsets = [16, 0], sizes = [1, 128], strides = [1, 1]} : vector<24x128xf32> to vector<1x128xf32>
    %35 = arith.addf %24, %34 : vector<1x128xf32>
    %c3 = arith.constant 3 : index
    %c0_8 = arith.constant 0 : index
    %36 = vector.load %arg1[%c3, %c0_8] : memref<8x128xi32, #tpu.memory_space<vmem>>, vector<1x128xi32>
    %c15_i32 = arith.constant 15 : i32
    %37 = vector.broadcast %c15_i32 : i32 to vector<1x128xi32>
    %38 = arith.addi %36, %37 : vector<1x128xi32>
    %39 = vector.broadcast %38 : vector<1x128xi32> to vector<128x128xi32>
    %40 = arith.cmpi eq, %1, %39 : vector<128x128xi32>
    %41 = arith.extui %40 : vector<128x128xi1> to vector<128x128xi32>
    %42 = arith.sitofp %41 : vector<128x128xi32> to vector<128x128xf32>
    %cst_9 = arith.constant dense<0.000000e+00> : vector<24x128xf32>
    %43 = tpu.matmul %0, %42, %cst_9 {dimension_numbers = #tpu.dot_dimension_numbers<[1], [0], [0], [1], [0, 0, 1, 1], [], []>} : vector<24x128xf32>, vector<128x128xf32>, vector<24x128xf32> -> vector<24x128xf32>
    %44 = vector.extract_strided_slice %43 {offsets = [0, 0], sizes = [16, 128], strides = [1, 1]} : vector<24x128xf32> to vector<16x128xf32>
    %45 = vector.extract_strided_slice %43 {offsets = [16, 0], sizes = [1, 128], strides = [1, 1]} : vector<24x128xf32> to vector<1x128xf32>
    %46 = arith.addf %35, %45 : vector<1x128xf32>
    %47 = tpu.concatenate %11, %22, %33, %44 in 0 : vector<16x128xf32>, vector<16x128xf32>, vector<16x128xf32>, vector<16x128xf32> -> vector<64x128xf32>
    %48 = arith.addf %11, %22 : vector<16x128xf32>
    %49 = arith.addf %48, %33 : vector<16x128xf32>
    %50 = arith.addf %49, %44 : vector<16x128xf32>
    %51 = arith.mulf %50, %50 : vector<16x128xf32>
    %cst_10 = arith.constant dense<0.000000e+00> : vector<128xf32>
    %52 = vector.multi_reduction <add>, %51, %cst_10 [0] : vector<16x128xf32> to vector<128xf32>
    %53 = vector.shape_cast %52 : vector<128xf32> to vector<1x128xf32>
    %54 = arith.mulf %47, %47 : vector<64x128xf32>
    %cst_11 = arith.constant dense<0.000000e+00> : vector<128xf32>
    %55 = vector.multi_reduction <add>, %54, %cst_11 [0] : vector<64x128xf32> to vector<128xf32>
    %56 = vector.shape_cast %55 : vector<128xf32> to vector<1x128xf32>
    %57 = arith.subf %53, %56 : vector<1x128xf32>
    %cst_12 = arith.constant 5.000000e-01 : f32
    %58 = vector.broadcast %cst_12 : f32 to vector<1x128xf32>
    %59 = arith.mulf %58, %57 : vector<1x128xf32>
    %c0_13 = arith.constant 0 : index
    %c0_14 = arith.constant 0 : index
    %60 = vector.load %arg5[%c0_13, %c0_14] : memref<97x1xf32, #tpu.memory_space<vmem>>, vector<64x1xf32>
    %c64 = arith.constant 64 : index
    %c0_15 = arith.constant 0 : index
    %61 = vector.load %arg5[%c64, %c0_15] : memref<97x1xf32, #tpu.memory_space<vmem>>, vector<16x1xf32>
    %c80 = arith.constant 80 : index
    %c0_16 = arith.constant 0 : index
    %62 = vector.load %arg5[%c80, %c0_16] : memref<97x1xf32, #tpu.memory_space<vmem>>, vector<16x1xf32>
    %c96 = arith.constant 96 : index
    %c0_17 = arith.constant 0 : index
    %63 = vector.load %arg5[%c96, %c0_17] : memref<97x1xf32, #tpu.memory_space<vmem>>, vector<1x1xf32>
    %c0_18 = arith.constant 0 : index
    %c0_19 = arith.constant 0 : index
    %64 = vector.load %arg3[%c0_18, %c0_19] : memref<64x64xf32, #tpu.memory_space<vmem>>, vector<64x64xf32>
    %cst_20 = arith.constant dense<0.000000e+00> : vector<64x128xf32>
    %65 = tpu.matmul %64, %47, %cst_20 {dimension_numbers = #tpu.dot_dimension_numbers<[1], [0], [0], [1], [0, 0, 1, 1], [], []>} : vector<64x64xf32>, vector<64x128xf32>, vector<64x128xf32> -> vector<64x128xf32>
    %66 = vector.broadcast %60 : vector<64x1xf32> to vector<64x128xf32>
    %67 = arith.addf %65, %66 : vector<64x128xf32>
    %cst_21 = arith.constant 5.000000e-01 : f32
    %68 = vector.broadcast %cst_21 : f32 to vector<64x128xf32>
    %69 = arith.mulf %68, %67 : vector<64x128xf32>
    %cst_22 = arith.constant 4.471500e-02 : f32
    %70 = vector.broadcast %cst_22 : f32 to vector<64x128xf32>
    %71 = arith.mulf %70, %67 : vector<64x128xf32>
    %72 = arith.mulf %71, %67 : vector<64x128xf32>
    %73 = arith.mulf %72, %67 : vector<64x128xf32>
    %74 = arith.addf %67, %73 : vector<64x128xf32>
    %cst_23 = arith.constant 0.797884583 : f32
    %75 = vector.broadcast %cst_23 : f32 to vector<64x128xf32>
    %76 = arith.mulf %75, %74 : vector<64x128xf32>
    %77 = math.tanh %76 : vector<64x128xf32>
    %cst_24 = arith.constant 1.000000e+00 : f32
    %78 = vector.broadcast %cst_24 : f32 to vector<64x128xf32>
    %79 = arith.addf %78, %77 : vector<64x128xf32>
    %80 = arith.mulf %69, %79 : vector<64x128xf32>
    %c0_25 = arith.constant 0 : index
    %c0_26 = arith.constant 0 : index
    %81 = vector.load %arg4[%c0_25, %c0_26] : memref<16x64xf32, #tpu.memory_space<vmem>>, vector<16x64xf32>
    %cst_27 = arith.constant dense<0.000000e+00> : vector<16x128xf32>
    %82 = tpu.matmul %81, %80, %cst_27 {dimension_numbers = #tpu.dot_dimension_numbers<[1], [0], [0], [1], [0, 0, 1, 1], [], []>} : vector<16x64xf32>, vector<64x128xf32>, vector<16x128xf32> -> vector<16x128xf32>
    %83 = vector.broadcast %61 : vector<16x1xf32> to vector<16x128xf32>
    %84 = arith.addf %82, %83 : vector<16x128xf32>
    %cst_28 = arith.constant 5.000000e-01 : f32
    %85 = vector.broadcast %cst_28 : f32 to vector<16x128xf32>
    %86 = arith.mulf %85, %84 : vector<16x128xf32>
    %cst_29 = arith.constant 4.471500e-02 : f32
    %87 = vector.broadcast %cst_29 : f32 to vector<16x128xf32>
    %88 = arith.mulf %87, %84 : vector<16x128xf32>
    %89 = arith.mulf %88, %84 : vector<16x128xf32>
    %90 = arith.mulf %89, %84 : vector<16x128xf32>
    %91 = arith.addf %84, %90 : vector<16x128xf32>
    %cst_30 = arith.constant 0.797884583 : f32
    %92 = vector.broadcast %cst_30 : f32 to vector<16x128xf32>
    %93 = arith.mulf %92, %91 : vector<16x128xf32>
    %94 = math.tanh %93 : vector<16x128xf32>
    %cst_31 = arith.constant 1.000000e+00 : f32
    %95 = vector.broadcast %cst_31 : f32 to vector<16x128xf32>
    %96 = arith.addf %95, %94 : vector<16x128xf32>
    %97 = arith.mulf %86, %96 : vector<16x128xf32>
    %98 = vector.broadcast %62 : vector<16x1xf32> to vector<16x128xf32>
    %99 = arith.mulf %97, %98 : vector<16x128xf32>
    %cst_32 = arith.constant dense<0.000000e+00> : vector<128xf32>
    %100 = vector.multi_reduction <add>, %99, %cst_32 [0] : vector<16x128xf32> to vector<128xf32>
    %101 = vector.shape_cast %100 : vector<128xf32> to vector<1x128xf32>
    %102 = arith.addf %46, %59 : vector<1x128xf32>
    %103 = arith.addf %102, %101 : vector<1x128xf32>
    %104 = vector.broadcast %63 : vector<1x1xf32> to vector<1x128xf32>
    %105 = arith.addf %103, %104 : vector<1x128xf32>
    %106 = arith.negf %105 : vector<1x128xf32>
    %107 = math.exp %106 : vector<1x128xf32>
    %cst_33 = arith.constant 1.000000e+00 : f32
    %108 = vector.broadcast %cst_33 : f32 to vector<1x128xf32>
    %109 = arith.addf %108, %107 : vector<1x128xf32>
    %110 = arith.divf %108, %109 : vector<1x128xf32>
    %c0_34 = arith.constant 0 : index
    %c0_35 = arith.constant 0 : index
    %111 = vector.load %arg6[%c0_34, %c0_35] : memref<1x128xf32, #tpu.memory_space<vmem>>, vector<1x128xf32>
    tpu.vector_store %arg6[%c0_34, %c0_35], %110 {strides = array<i32>} : memref<1x128xf32, #tpu.memory_space<vmem>>, vector<1x128xf32>,
    return
  }
  func.func @transform_0(%arg0: i32) -> (i32, i32) {
    %c0_i32 = arith.constant 0 : i32
    %c0_i32_0 = arith.constant 0 : i32
    return %c0_i32, %arg0 : i32, i32
  }
  func.func @transform_1(%arg0: i32) -> (i32, i32) {
    %c0_i32 = arith.constant 0 : i32
    %c0_i32_0 = arith.constant 0 : i32
    %c0_i32_1 = arith.constant 0 : i32
    return %c0_i32, %c0_i32_0 : i32, i32
  }
  func.func @transform_2(%arg0: i32) -> (i32, i32) {
    %c0_i32 = arith.constant 0 : i32
    %c0_i32_0 = arith.constant 0 : i32
    %c0_i32_1 = arith.constant 0 : i32
    return %c0_i32, %c0_i32_0 : i32, i32
  }
  func.func @transform_3(%arg0: i32) -> (i32, i32) {
    %c0_i32 = arith.constant 0 : i32
    %c0_i32_0 = arith.constant 0 : i32
    %c0_i32_1 = arith.constant 0 : i32
    return %c0_i32, %c0_i32_0 : i32, i32
  }
  func.func @transform_4(%arg0: i32) -> (i32, i32) {
    %c0_i32 = arith.constant 0 : i32
    %c0_i32_0 = arith.constant 0 : i32
    %c0_i32_1 = arith.constant 0 : i32
    return %c0_i32, %c0_i32_0 : i32, i32
  }
  func.func @transform_5(%arg0: i32) -> (i32, i32) {
    %c0_i32 = arith.constant 0 : i32
    %c0_i32_0 = arith.constant 0 : i32
    return %c0_i32, %arg0 : i32, i32
  }
}

</mosaic_0001>

<bundles_post_ra>
// kernel: tpu_custom_call.1
= control target key start
LH: loop header
LB: loop body
LE: loop exit
PB: predicated region body
PF: predicated region fallthrough
CT: control target
= control target key end

     0   :  { %v24_v0 = vlaneseq  ;;  %v1677_v1 = vmov 0.0|0.0   ;;  %vm1678_vm0 = vmmov 0   ;;  %v1679_v6 = vmov 0.0   ;;  %s2172_s0 = inlined_call_operand.vmem [shape: s32[8,128], index: 0, kind: input, shape index: {}]   ;;  %s2173_s1 = inlined_call_operand.vmem [shape: f32[24,128], index: 1, kind: input, shape index: {}]   ;;  %s2174_s2 = inlined_call_operand.vmem [shape: f32[64,64], index: 2, kind: input, shape index: {}]   ;;  %s2175_s3 = inlined_call_operand.vmem [shape: f32[16,64], index: 3, kind: input, shape index: {}]   ;;  %s2176_s4 = inlined_call_operand.vmem [shape: f32[97,1], index: 4, kind: input, shape index: {}]   ;;  %s2177_s5 = inlined_call_operand.hbm [shape: f32[1,128], index: 5, kind: output, shape index: {}]  }
   0x1   :  { %1493 = vmatprep.subr.bf16.mxu0 %v1677_v1  ;;  %v1717_v2 = vld [vmem:[%s2172_s0] ss:$0 sm:$0xff]  ;;  %1517 = vmatprep.subr.bf16.mxu1 %v1677_v1  ;;  %v175_v3 = vld [vmem:[%s2172_s0 + $0x1] sm:$0x1] }
   0x2   :  { %v1723_v4 = vshrl.u32 %v24_v0, 7  ;;  %v176_v5 = vadd.s32 3, %v175_v3  ;;  %1314 = vmatprep.mubr.msk.f32.mxu0 %vm1678_vm0, %v1679_v6  ;;  %1355 = vmatprep.mubr.msk.f32.mxu1 %vm1678_vm0, %v1679_v6 }
   0x3   :  { %10 = vsyncpa [#allocation3], 0  ;;  %v1680_v14 = vmov 1.0|1.0   ;;  %v310_v23 = vld [vmem:[%s2172_s0 + $0x2] sm:$0x1] }
   0x4   :  { %v1730_v7 = vadd.s32 8, %v1723_v4  ;;  %vm46_vm1 = vcmp.eq.s32.totalorder %v1723_v4, %v1717_v2  ;;  %v1735_v8 = vsub.s32 0, %v1723_v4  ;;  %v1738_v9 = vadd.s32 16, %v1723_v4  ;;  %v445_v25 = vld [vmem:[%s2172_s0 + $0x3] sm:$0x1]  ;;  %v1912_v32 = vld [vmem:[%s2173_s1 + $0x8] sm:$0xff] }
   0x5   :  { %v1741_v10 = vadd.s32 24, %v1723_v4  ;;  %v1744_v11 = vadd.s32 32, %v1723_v4  ;;  %v1754_v13 = vadd.s32 40, %v1723_v4  ;;  %v1774_v15 = vadd.s32 48, %v1723_v4  ;;  %v1892_v31 = vld [vmem:[%s2173_s1] sm:$0xff]  ;;  %v1939_v33 = vld [vmem:[%s2173_s1 + $0x10] sm:$0xff] }
   0x6   :  { %vm47_vm2 = vcmp.eq.s32.totalorder %v1730_v7, %v1717_v2  ;;  %v1749_v12 = vrot.slane %v176_v5, %v1735_v8  ;;  %vm48_vm3 = vcmp.eq.s32.totalorder %v1738_v9, %v1717_v2  ;;  %v1777_v16 = vadd.s32 56, %v1723_v4  ;;  %v631_v34 = vld [vmem:[%s2174_s2] sm:$0xff]  ;;  %v620_v36 = vld [vmem:[%s2176_s4 + $0x10] sm:$0xff]  ;;  %v619_v38 = vld [vmem:[%s2176_s4 + $0x8] sm:$0xff] }
   0x7   :  { %vm1494_vm4 = vmpackc.low %vm47_vm2, %vm46_vm1  ;;  %vm49_vm5 = vcmp.eq.s32.totalorder %v1741_v10, %v1717_v2  ;;  %vm50_vm12 = vcmp.eq.s32.totalorder %v1744_v11, %v1717_v2  ;;  %vm51_vm13 = vcmp.eq.s32.totalorder %v1754_v13, %v1717_v2  ;;  %v1792_v17 = vadd.s32 64, %v1723_v4  ;;  %v618_v35 = vld [vmem:[%s2176_s4] sm:$0xff]  ;;  %v621_v39 = vld [vmem:[%s2176_s4 + $0x18] sm:$0xff] }
   0x8   :  { %1495 = vmatpush3.bf16.msk.msra.mxu0 %vm1494_vm4, %v1680_v14  ;;  %vm181_vm6 = vcmp.eq.s32.totalorder %v1723_v4, %v1749_v12  ;;  %vm182_vm7 = vcmp.eq.s32.totalorder %v1730_v7, %v1749_v12  ;;  %vm1497_vm8 = vmpackc.low %vm49_vm5, %vm48_vm3  ;;  %vm183_vm9 = vcmp.eq.s32.totalorder %v1738_v9, %v1749_v12  ;;  %vm184_vm10 = vcmp.eq.s32.totalorder %v1741_v10, %v1749_v12  ;;  %v622_v40 = vld [vmem:[%s2176_s4 + $0x20] sm:$0xff]  ;;  %v623_v41 = vld [vmem:[%s2176_s4 + $0x28] sm:$0xff] }
   0x9   :  { %vm1518_vm11 = vmpackc.low %vm182_vm7, %vm181_vm6  ;;  %1496 = vmatprep.subr.bf16.mxu0 %v1677_v1  ;;  %vm185_vm15 = vcmp.eq.s32.totalorder %v1744_v11, %v1749_v12  ;;  %vm186_vm1 = vcmp.eq.s32.totalorder %v1754_v13, %v1749_v12  ;;  %vm52_vm3 = vcmp.eq.s32.totalorder %v1774_v15, %v1717_v2  ;;  %vm53_vm4 = vcmp.eq.s32.totalorder %v1777_v16, %v1717_v2  ;;  %v624_v42 = vld [vmem:[%s2176_s4 + $0x30] sm:$0xff]  ;;  %v625_v43 = vld [vmem:[%s2176_s4 + $0x38] sm:$0xff] }
   0xa   :  { %1519 = vmatpush3.bf16.msk.msra.mxu1 %vm1518_vm11, %v1680_v14  ;;  %vm1521_vm14 = vmpackc.low %vm184_vm10, %vm183_vm9  ;;  %v1795_v18 = vadd.s32 72, %v1723_v4  ;;  %vm187_vm6 = vcmp.eq.s32.totalorder %v1774_v15, %v1749_v12  ;;  %vm188_vm7 = vcmp.eq.s32.totalorder %v1777_v16, %v1749_v12  ;;  %vm54_vm9 = vcmp.eq.s32.totalorder %v1792_v17, %v1717_v2  ;;  %v626_v44 = vld [vmem:[%s2176_s4 + $0x40] sm:$0xff]  ;;  %v627_v45 = vld [vmem:[%s2176_s4 + $0x48] sm:$0xff] }
   0xb   :  { %1520 = vmatprep.subr.bf16.mxu1 %v1677_v1  ;;  %vm1500_vm2 = vmpackc.low %vm51_vm13, %vm50_vm12  ;;  %v1810_v19 = vadd.s32 80, %v1723_v4  ;;  %v1813_v20 = vadd.s32 88, %v1723_v4  ;;  %vm189_vm12 = vcmp.eq.s32.totalorder %v1792_v17, %v1749_v12  ;;  %v1828_v21 = vadd.s32 96, %v1723_v4  ;;  %v628_v46 = vld [vmem:[%s2176_s4 + $0x50] sm:$0xff]  ;;  %v629_v47 = vld [vmem:[%s2176_s4 + $0x58] sm:$0xff] }
   0xc   :  { %1498 = vmatpush3.bf16.msk.msra.mxu0 %vm1497_vm8, %v1680_v14  ;;  %vm1524_vm5 = vmpackc.low %vm186_vm1, %vm185_vm15  ;;  %vm55_vm10 = vcmp.eq.s32.totalorder %v1795_v18, %v1717_v2  ;;  %vm190_vm13 = vcmp.eq.s32.totalorder %v1795_v18, %v1749_v12  ;;  %v1831_v22 = vadd.s32 104, %v1723_v4  ;;  %v311_v24 = vadd.s32 8, %v310_v23  ;;  %v630_v48 = vld [vmem:[%s2176_s4 + $0x60] sm:$0x1] }
   0xd   :  { %1499 = vmatprep.subr.bf16.mxu0 %v1677_v1  ;;  %vm1503_vm8 = vmpackc.low %vm53_vm4, %vm52_vm3  ;;  %vm56_vm15 = vcmp.eq.s32.totalorder %v1810_v19, %v1717_v2  ;;  %vm57_vm1 = vcmp.eq.s32.totalorder %v1813_v20, %v1717_v2  ;;  %vm191_vm3 = vcmp.eq.s32.totalorder %v1810_v19, %v1749_v12  ;;  %vm192_vm4 = vcmp.eq.s32.totalorder %v1813_v20, %v1749_v12 }
   0xe   :  { %1522 = vmatpush3.bf16.msk.msra.mxu1 %vm1521_vm14, %v1680_v14  ;;  %vm1527_vm11 = vmpackc.low %vm188_vm7, %vm187_vm6  ;;  %vm58_vm6 = vcmp.eq.s32.totalorder %v1828_v21, %v1717_v2  ;;  %vm59_vm7 = vcmp.eq.s32.totalorder %v1831_v22, %v1717_v2  ;;  %v1852_v26 = vadd.s32 112, %v1723_v4  ;;  %v1855_v27 = vadd.s32 120, %v1723_v4 }
   0xf   :  { %1523 = vmatprep.subr.bf16.mxu1 %v1677_v1  ;;  %vm1506_vm14 = vmpackc.low %vm55_vm10, %vm54_vm9  ;;  %vm193_vm9 = vcmp.eq.s32.totalorder %v1828_v21, %v1749_v12  ;;  %vm194_vm10 = vcmp.eq.s32.totalorder %v1831_v22, %v1749_v12  ;;  %v446_v28 = vadd.s32 15, %v445_v25  ;;  %v1870_v29 = vrot.slane %v311_v24, %v1735_v8 }
  0x10   :  { %1501 = vmatpush3.bf16.msk.msra.mxu0 %vm1500_vm2, %v1680_v14  ;;  %vm1530_vm2 = vmpackc.low %vm190_vm13, %vm189_vm12  ;;  %vm60_vm12 = vcmp.eq.s32.totalorder %v1852_v26, %v1717_v2  ;;  %vm61_vm13 = vcmp.eq.s32.totalorder %v1855_v27, %v1717_v2  ;;  %v1681_v37 = vmov 0  }
  0x11   :  { %1502 = vmatprep.subr.bf16.mxu0 %v1677_v1  ;;  %v1879_v30 = vrot.slane %v446_v28, %v1735_v8  ;;  %1627 = vset.pattern.permute.xlu0 %v1681_v37 }
  0x12   :  { %1525 = vmatpush3.bf16.msk.msra.mxu1 %vm1524_vm5, %v1680_v14  ;;  %vm1509_vm5 = vmpackc.low %vm57_vm1, %vm56_vm15  ;;  %vm195_vm15 = vcmp.eq.s32.totalorder %v1852_v26, %v1749_v12  ;;  %vm196_vm1 = vcmp.eq.s32.totalorder %v1855_v27, %v1749_v12  ;;  %1628 = vset.pattern.permute.xlu1 %v1681_v37 }
  0x13   :  { %1526 = vmatprep.subr.bf16.mxu1 %v1677_v1  ;;  %641 = vperm.xlu0 %1627, %v618_v35  }
  0x14   :  { %1504 = vmatpush3.bf16.msk.msra.mxu0 %vm1503_vm8, %v1680_v14  ;;  %vm1533_vm8 = vmpackc.low %vm192_vm4, %vm191_vm3  ;;  %vm316_vm3 = vcmp.eq.s32.totalorder %v1723_v4, %v1870_v29  ;;  %vm317_vm4 = vcmp.eq.s32.totalorder %v1730_v7, %v1870_v29  ;;  %651 = vperm.xlu1 %1628, %v620_v36  }
  0x15   :  { %1505 = vmatprep.subr.bf16.mxu0 %v1677_v1 }
  0x16   :  { %1528 = vmatpush3.bf16.msk.msra.mxu1 %vm1527_vm11, %v1680_v14  ;;  %vm1512_vm11 = vmpackc.low %vm59_vm7, %vm58_vm6  ;;  %vm451_vm6 = vcmp.eq.s32.totalorder %v1723_v4, %v1879_v30  ;;  %vm452_vm7 = vcmp.eq.s32.totalorder %v1730_v7, %v1879_v30 }
  0x17   :  { %1529 = vmatprep.subr.bf16.mxu1 %v1677_v1  ;;  %646 = vperm.xlu0 %1627, %v619_v38  }
  0x18   :  { %1507 = vmatpush3.bf16.msk.msra.mxu0 %vm1506_vm14, %v1680_v14  ;;  %vm1536_vm14 = vmpackc.low %vm194_vm10, %vm193_vm9  ;;  %vm318_vm9 = vcmp.eq.s32.totalorder %v1738_v9, %v1870_v29  ;;  %vm319_vm10 = vcmp.eq.s32.totalorder %v1741_v10, %v1870_v29  ;;  %656 = vperm.xlu1 %1628, %v621_v39  }
  0x19   :  { %1508 = vmatprep.subr.bf16.mxu0 %v1677_v1 }
  0x1a   :  { %1531 = vmatpush3.bf16.msk.msra.mxu1 %vm1530_vm2, %v1680_v14  ;;  %vm1515_vm2 = vmpackc.low %vm61_vm13, %vm60_vm12  ;;  %vm453_vm12 = vcmp.eq.s32.totalorder %v1738_v9, %v1879_v30  ;;  %vm454_vm13 = vcmp.eq.s32.totalorder %v1741_v10, %v1879_v30 }
  0x1b   :  { %1532 = vmatprep.subr.bf16.mxu1 %v1677_v1  ;;  %661 = vperm.xlu0 %1627, %v622_v40   ;;  %v632_v40 = vld [vmem:[%s2174_s2 + $0x8] sm:$0xff] }
  0x1c   :  { %1510 = vmatpush3.bf16.msk.msra.mxu0 %vm1509_vm5, %v1680_v14  ;;  %vm1539_vm5 = vmpackc.low %vm196_vm1, %vm195_vm15  ;;  %vm320_vm15 = vcmp.eq.s32.totalorder %v1744_v11, %v1870_v29  ;;  %vm321_vm1 = vcmp.eq.s32.totalorder %v1754_v13, %v1870_v29  ;;  %666 = vperm.xlu1 %1628, %v623_v41  }
  0x1d   :  { %1511 = vmatprep.subr.bf16.mxu0 %v1677_v1 }
  0x1e   :  { %1534 = vmatpush3.bf16.msk.msra.mxu1 %vm1533_vm8, %v1680_v14  ;;  %vm1542_vm8 = vmpackc.low %vm317_vm4, %vm316_vm3  ;;  %vm455_vm3 = vcmp.eq.s32.totalorder %v1744_v11, %v1879_v30  ;;  %vm456_vm4 = vcmp.eq.s32.totalorder %v1754_v13, %v1879_v30 }
  0x1f   :  { %1535 = vmatprep.subr.bf16.mxu1 %v1677_v1  ;;  %671 = vperm.xlu0 %1627, %v624_v42  }
  0x20   :  { %1513 = vmatpush3.bf16.msk.msra.mxu0 %vm1512_vm11, %v1680_v14  ;;  %vm1566_vm11 = vmpackc.low %vm452_vm7, %vm451_vm6  ;;  %vm322_vm6 = vcmp.eq.s32.totalorder %v1774_v15, %v1870_v29  ;;  %vm323_vm7 = vcmp.eq.s32.totalorder %v1777_v16, %v1870_v29  ;;  %676 = vperm.xlu1 %1628, %v625_v43   ;;  %v633_v43 = vld [vmem:[%s2174_s2 + $0x10] sm:$0xff] }
  0x21   :  { %1514 = vmatprep.subr.bf16.mxu0 %v1677_v1 }
  0x22   :  { %1537 = vmatpush3.bf16.msk.msra.mxu1 %vm1536_vm14, %v1680_v14  ;;  %vm1545_vm14 = vmpackc.low %vm319_vm10, %vm318_vm9  ;;  %vm457_vm9 = vcmp.eq.s32.totalorder %v1774_v15, %v1879_v30  ;;  %vm458_vm10 = vcmp.eq.s32.totalorder %v1777_v16, %v1879_v30 }
  0x23   :  { %1538 = vmatprep.subr.bf16.mxu1 %v1677_v1  ;;  %885 = vperm.xlu0 %1627, %v626_v44  }
  0x24   :  { %1516 = vmatpush3.bf16.msk.msra.mxu0 %vm1515_vm2, %v1680_v14  ;;  %vm1569_vm2 = vmpackc.low %vm454_vm13, %vm453_vm12  ;;  %vm324_vm12 = vcmp.eq.s32.totalorder %v1792_v17, %v1870_v29  ;;  %vm325_vm13 = vcmp.eq.s32.totalorder %v1795_v18, %v1870_v29  ;;  %890 = vperm.xlu1 %1628, %v627_v45  }
  0x25   :  { %1541 = vmatprep.subr.bf16.mxu0 %v1677_v1 }
  0x26   :  { %1540 = vmatpush3.bf16.msk.msra.mxu1 %vm1539_vm5, %v1680_v14  ;;  %vm1548_vm5 = vmpackc.low %vm321_vm1, %vm320_vm15  ;;  %vm459_vm15 = vcmp.eq.s32.totalorder %v1792_v17, %v1879_v30  ;;  %vm460_vm1 = vcmp.eq.s32.totalorder %v1795_v18, %v1879_v30 }
  0x27   :  { %1315 = vmatmul.mubr.f32.vlgmr.msra.gmra.mrb[0].mxu0 %v1892_v31  ;;  %1565 = vmatprep.subr.bf16.mxu1 %v1677_v1 }
  0x28   :  { %1543 = vmatpush3.bf16.msk.msra.mxu0 %vm1542_vm8, %v1680_v14  ;;  %1317 = vmatprep.mubr.msk.f32.mxu0 %vm1678_vm0, %v1679_v6  ;;  %vm1572_vm8 = vmpackc.low %vm456_vm4, %vm455_vm3  ;;  %vm326_vm3 = vcmp.eq.s32.totalorder %v1810_v19, %v1870_v29  ;;  %vm327_vm4 = vcmp.eq.s32.totalorder %v1813_v20, %v1870_v29 }
  0x29   :  { %1356 = vmatmul.mubr.f32.vlgmr.msra.gmra.mrb[0].mxu1 %v1892_v31  ;;  %1544 = vmatprep.subr.bf16.mxu0 %v1677_v1 }
  0x2a   :  { %1567 = vmatpush3.bf16.msk.msra.mxu1 %vm1566_vm11, %v1680_v14  ;;  %1358 = vmatprep.mubr.msk.f32.mxu1 %vm1678_vm0, %v1679_v6  ;;  %vm1551_vm11 = vmpackc.low %vm323_vm7, %vm322_vm6  ;;  %vm461_vm6 = vcmp.eq.s32.totalorder %v1810_v19, %v1879_v30  ;;  %vm462_vm7 = vcmp.eq.s32.totalorder %v1813_v20, %v1879_v30 }
  0x2b   :  { %1318 = vmatmul.mubr.f32.gmra.mrb[2].mxu0 %v1912_v32  ;;  %1568 = vmatprep.subr.bf16.mxu1 %v1677_v1 }
  0x2c   :  { %1546 = vmatpush3.bf16.msk.msra.mxu0 %vm1545_vm14, %v1680_v14  ;;  %1320 = vmatprep.mubr.msk.f32.mxu0 %vm1678_vm0, %v1679_v6  ;;  %vm1575_vm14 = vmpackc.low %vm458_vm10, %vm457_vm9  ;;  %vm328_vm9 = vcmp.eq.s32.totalorder %v1828_v21, %v1870_v29  ;;  %vm329_vm10 = vcmp.eq.s32.totalorder %v1831_v22, %v1870_v29 }
  0x2d   :  { %1359 = vmatmul.mubr.f32.gmra.mrb[2].mxu1 %v1912_v32  ;;  %1547 = vmatprep.subr.bf16.mxu0 %v1677_v1 }
  0x2e   :  { %1570 = vmatpush3.bf16.msk.msra.mxu1 %vm1569_vm2, %v1680_v14  ;;  %1361 = vmatprep.mubr.msk.f32.mxu1 %vm1678_vm0, %v1679_v6  ;;  %vm1554_vm2 = vmpackc.low %vm325_vm13, %vm324_vm12  ;;  %vm463_vm12 = vcmp.eq.s32.totalorder %v1828_v21, %v1879_v30  ;;  %vm464_vm13 = vcmp.eq.s32.totalorder %v1831_v22, %v1879_v30 }
  0x2f   :  { %1571 = vmatprep.subr.bf16.mxu1 %v1677_v1  ;;  %1321 = vmatmul.mubr.f32.gmra.mrb[4].mxu0 %v1939_v33 }
  0x30   :  { %1549 = vmatpush3.bf16.msk.msra.mxu0 %vm1548_vm5, %v1680_v14  ;;  %1396 = vmatprep.mubr.msk.f32.mxu0 %vm1678_vm0, %v1679_v6  ;;  %vm1578_vm5 = vmpackc.low %vm460_vm1, %vm459_vm15  ;;  %vm330_vm15 = vcmp.eq.s32.totalorder %v1852_v26, %v1870_v29  ;;  %vm331_vm1 = vcmp.eq.s32.totalorder %v1855_v27, %v1870_v29 }
  0x31   :  { %1550 = vmatprep.subr.bf16.mxu0 %v1677_v1  ;;  %1362 = vmatmul.mubr.f32.gmra.mrb[4].mxu1 %v1939_v33 }
  0x32   :  { %1573 = vmatpush3.bf16.msk.msra.mxu1 %vm1572_vm8, %v1680_v14  ;;  %1437 = vmatprep.mubr.msk.f32.mxu1 %vm1678_vm0, %v1679_v6  ;;  %vm1557_vm8 = vmpackc.low %vm327_vm4, %vm326_vm3  ;;  %vm465_vm3 = vcmp.eq.s32.totalorder %v1852_v26, %v1879_v30  ;;  %vm466_vm4 = vcmp.eq.s32.totalorder %v1855_v27, %v1879_v30 }
  0x33   :  { %1574 = vmatprep.subr.bf16.mxu1 %v1677_v1  ;;  %994 = vperm.xlu0 %1627, %v628_v46   ;;  %v634_v46 = vld [vmem:[%s2174_s2 + $0x18] sm:$0xff] }
  0x34   :  { %1552 = vmatpush3.bf16.msk.msra.mxu0 %vm1551_vm11, %v1680_v14  ;;  %vm1581_vm11 = vmpackc.low %vm462_vm7, %vm461_vm6  ;;  %vm679_vm7 = vcmask 523264   ;;  %999 = vperm.xlu1 %1628, %v629_v47  }
  0x35   :  { %1553 = vmatprep.subr.bf16.mxu0 %v1677_v1  ;;  %vm1587_vm6 = vmpackc.low %vm466_vm4, %vm465_vm3 }
  0x36   :  { %1576 = vmatpush3.bf16.msk.msra.mxu1 %vm1575_vm14, %v1680_v14  ;;  %vm1560_vm14 = vmpackc.low %vm329_vm10, %vm328_vm9 }
  0x37   :  { %1577 = vmatprep.subr.bf16.mxu1 %v1677_v1  ;;  %1015 = vperm.xlu0 %1627, %v630_v48  }
  0x38   :  { %1555 = vmatpush3.bf16.msk.msra.mxu0 %vm1554_vm2, %v1680_v14  ;;  %vm1584_vm2 = vmpackc.low %vm464_vm13, %vm463_vm12 }
  0x39   :  { %1556 = vmatprep.subr.bf16.mxu0 %v1677_v1 }
  0x3a   :  { %1579 = vmatpush3.bf16.msk.msra.mxu1 %vm1578_vm5, %v1680_v14  ;;  %vm1563_vm5 = vmpackc.low %vm331_vm1, %vm330_vm15 }
  0x3b   :  { %1580 = vmatprep.subr.bf16.mxu1 %v1677_v1 }
  0x3c   :  { %1558 = vmatpush3.bf16.msk.msra.mxu0 %vm1557_vm8, %v1680_v14 }
  0x3d   :  { %1559 = vmatprep.subr.bf16.mxu0 %v1677_v1 }
  0x3e   :  { %1582 = vmatpush3.bf16.msk.msra.mxu1 %vm1581_vm11, %v1680_v14 }
  0x3f   :  { %1583 = vmatprep.subr.bf16.mxu1 %v1677_v1 }
  0x40   :  { %1561 = vmatpush3.bf16.msk.msra.mxu0 %vm1560_vm14, %v1680_v14 }
  0x41   :  { %1562 = vmatprep.subr.bf16.mxu0 %v1677_v1 }
  0x42   :  { %1585 = vmatpush3.bf16.msk.msra.mxu1 %vm1584_vm2, %v1680_v14 }
  0x43   :  { %1586 = vmatprep.subr.bf16.mxu1 %v1677_v1 }
  0x44   :  { %1564 = vmatpush3.bf16.msk.msra.mxu0 %vm1563_vm5, %v1680_v14 }
  0x46   :  { %1588 = vmatpush3.bf16.msk.msra.mxu1 %vm1587_vm6, %v1680_v14 }
  0x47   :  { %1397 = vmatmul.mubr.f32.vlgmr.msra.gmra.mrb[6].mxu0 %v1892_v31 }
  0x48   :  { %1399 = vmatprep.mubr.msk.f32.mxu0 %vm1678_vm0, %v1679_v6 }
  0x49   :  { %1438 = vmatmul.mubr.f32.vlgmr.msra.gmra.mrb[6].mxu1 %v1892_v31 }
  0x4a   :  { %1440 = vmatprep.mubr.msk.f32.mxu1 %vm1678_vm0, %v1679_v6 }
  0x4b   :  { %1400 = vmatmul.mubr.f32.gmra.mrb[8].mxu0 %v1912_v32 }
  0x4c   :  { %1402 = vmatprep.mubr.msk.f32.mxu0 %vm1678_vm0, %v1679_v6 }
  0x4d   :  { %1441 = vmatmul.mubr.f32.gmra.mrb[8].mxu1 %v1912_v32 }
  0x4e   :  { %1443 = vmatprep.mubr.msk.f32.mxu1 %vm1678_vm0, %v1679_v6 }
  0x4f   :  { %1403 = vmatmul.mubr.f32.gmra.mrb[10].mxu0 %v1939_v33 }
  0x50   :  { %1462 = vmatprep.mubr.msk.f32.mxu0 %vm679_vm7, %v631_v34 }
  0x51   :  { %1444 = vmatmul.mubr.f32.gmra.mrb[10].mxu1 %v1939_v33 }
  0xfa   :  { %v160_v49 = vpop.f32.mrb[0].mxu0 }
  0xfb   :  { %v1316_v50 = vpop.f32.mrb[1].mxu0  ;;  %v595_v55 = vmul.f32 %v160_v49, %v160_v49 }
  0xfc   :  { %v295_v51 = vpop.f32.mrb[0].mxu1 }
  0xfd   :  { %v580_v52 = vadd.f32 %v295_v51, %v160_v49  ;;  %v1357_v53 = vpop.f32.mrb[1].mxu1  ;;  %v597_v56 = vmul.f32 %v295_v51, %v295_v51 }
  0xfe   :  { %v165_v54 = vpop.f32.mrb[2].mxu0 }
  0xff   :  { %v596_v57 = vmul.f32 %v165_v54, %v165_v54  ;;  %v1589_v58 = vpack.c.bf16 %v165_v54, %v160_v49  ;;  %v1319_v59 = vpop.f32.mrb[3].mxu0  ;;  %v635_v49 = vld [vmem:[%s2174_s2 + $0x20] sm:$0xff] }
 0x100   :  { %v300_v60 = vpop.f32.mrb[2].mxu1 }
 0x101   :  { %v603_v61 = vadd.f32 %v596_v57, %v595_v55  ;;  %v581_v62 = vadd.f32 %v300_v60, %v165_v54  ;;  %v598_v63 = vmul.f32 %v300_v60, %v300_v60  ;;  %v1593_v0 = vpack.c.bf16 %v300_v60, %v295_v51  ;;  %1590 = vmatprep.subr.bf16.mxu0 %v1589_v58  ;;  %v1360_v1 = vpop.f32.mrb[3].mxu1  ;;  %v637_v55 = vld [vmem:[%s2174_s2 + $0x30] sm:$0xff] }
 0x102   :  { %1592 = vmatpush3.bf16.msra.mxu0 %v1589_v58  ;;  %v170_v2 = vpop.f32.mrb[4].mxu0  ;;  %v638_v58 = vld [vmem:[%s2174_s2 + $0x38] sm:$0xff] }
 0x103   :  { %v604_v3 = vadd.f32 %v603_v61, %v597_v56  ;;  %1594 = vmatprep.subr.bf16.mxu0 %v1593_v0  ;;  %v1322_v4 = vpop.f32.mrb[5].mxu0 }
 0x104   :  { %v305_v5 = vpop.f32.mrb[4].mxu1 }
 0x105   :  { %v605_v6 = vadd.f32 %v604_v3, %v598_v63  ;;  %v309_v7 = vadd.f32 %v305_v5, %v170_v2  ;;  %v1363_v8 = vpop.f32.mrb[5].mxu1  ;;  %v642_v63 = vpop.permute.xlu0 %641 }
 0x106   :  { %1596 = vmatpush3.bf16.msra.mxu0 %v1593_v0  ;;  %v652_v0 = vpop.permute.xlu1 %651 }
 0x109   :  { %v647_v1 = vpop.permute.xlu0 %646 }
 0x10a   :  { %v657_v2 = vpop.permute.xlu1 %656 }
 0x11a   :  { %v430_v9 = vpop.f32.mrb[6].mxu0 }
 0x11b   :  { %v582_v10 = vadd.f32 %v580_v52, %v430_v9  ;;  %v599_v11 = vmul.f32 %v430_v9, %v430_v9  ;;  %v1398_v12 = vpop.f32.mrb[7].mxu0  ;;  %v636_v52 = vld [vmem:[%s2174_s2 + $0x28] sm:$0xff] }
 0x11c   :  { %v565_v13 = vpop.f32.mrb[6].mxu1 }
 0x11d   :  { %v606_v14 = vadd.f32 %v605_v6, %v599_v11  ;;  %v584_v15 = vadd.f32 %v582_v10, %v565_v13  ;;  %v1439_v16 = vpop.f32.mrb[7].mxu1  ;;  %v601_v22 = vmul.f32 %v565_v13, %v565_v13 }
 0x11e   :  { %v435_v17 = vpop.f32.mrb[8].mxu0  ;;  %v662_v16 = vpop.permute.xlu0 %661 }
 0x11f   :  { %v583_v18 = vadd.f32 %v581_v62, %v435_v17  ;;  %v600_v19 = vmul.f32 %v435_v17, %v435_v17  ;;  %v1597_v20 = vpack.c.bf16 %v435_v17, %v430_v9  ;;  %v1401_v21 = vpop.f32.mrb[9].mxu0  ;;  %v586_v30 = vmul.f32 %v584_v15, %v584_v15  ;;  %v881_v62 = vld [vmem:[%s2175_s3] sm:$0xff] }
 0x120   :  { %v570_v23 = vpop.f32.mrb[8].mxu1  ;;  %1490 = vmatprep.mubr.msk.f32.mxu1 %vm679_vm7, %v881_v62 }
 0x121   :  { %v607_v24 = vadd.f32 %v606_v14, %v600_v19  ;;  %v585_v25 = vadd.f32 %v583_v18, %v570_v23  ;;  %v602_v26 = vmul.f32 %v570_v23, %v570_v23  ;;  %v1601_v27 = vpack.c.bf16 %v570_v23, %v565_v13  ;;  %1598 = vmatprep.subr.bf16.mxu0 %v1597_v20  ;;  %v1442_v28 = vpop.f32.mrb[9].mxu1  ;;  %v667_v13 = vpop.permute.xlu1 %666 }
 0x122   :  { %v440_v29 = vpop.f32.mrb[10].mxu0  ;;  %1600 = vmatpush3.bf16.msra.mxu0 %v1597_v20 }
 0x123   :  { %v587_v31 = vmul.f32 %v585_v25, %v585_v25  ;;  %v608_v32 = vadd.f32 %v607_v24, %v601_v22  ;;  %v444_v33 = vadd.f32 %v440_v29, %v309_v7  ;;  %1602 = vmatprep.subr.bf16.mxu0 %v1601_v27  ;;  %v1404_v34 = vpop.f32.mrb[11].mxu0 }
 0x124   :  { %v575_v35 = vpop.f32.mrb[10].mxu1 }
 0x125   :  { %v588_v36 = vadd.f32 %v587_v31, %v586_v30  ;;  %v609_v37 = vadd.f32 %v608_v32, %v602_v26  ;;  %v579_v38 = vadd.f32 %v575_v35, %v444_v33  ;;  %v1445_v39 = vpop.f32.mrb[11].mxu1  ;;  %v677_v32 = vpop.permute.xlu1 %676 }
 0x126   :  { %1604 = vmatpush3.bf16.msra.mxu0 %v1601_v27 }
 0x127   :  { %v589_v41 = vrot.slane %v588_v36, 4  ;;  %v610_v42 = vrot.slane %v609_v37, 4 }
 0x129   :  { %v590_v44 = vadd.f32 %v589_v41, %v588_v36  ;;  %v611_v45 = vadd.f32 %v610_v42, %v609_v37  ;;  %1463 = vmatmul.mubr.msk.f32.vlgmr.msra.gmra.mrb[12].mxu0 %vm679_vm7, %v632_v40  ;;  %v672_v37 = vpop.permute.xlu0 %671 }
 0x12a   :  { %1465 = vmatprep.mubr.msk.f32.mxu0 %vm679_vm7, %v633_v43 }
 0x12b   :  { %v591_v47 = vrot.slane %v590_v44, 2  ;;  %v612_v48 = vrot.slane %v611_v45, 2 }
 0x12d   :  { %v592_v50 = vadd.f32 %v591_v47, %v590_v44  ;;  %v613_v51 = vadd.f32 %v612_v48, %v611_v45  ;;  %1466 = vmatmul.mubr.msk.f32.gmra.mrb[14].mxu0 %vm679_vm7, %v634_v46 }
 0x12e   :  { %1468 = vmatprep.mubr.msk.f32.mxu0 %vm679_vm7, %v635_v49 }
 0x12f   :  { %v593_v53 = vrot.slane %v592_v50, 1  ;;  %v614_v54 = vrot.slane %v613_v51, 1 }
 0x131   :  { %v594_v56 = vadd.f32 %v593_v53, %v592_v50  ;;  %v615_v57 = vadd.f32 %v614_v54, %v613_v51  ;;  %1469 = vmatmul.mubr.msk.f32.gmra.mrb[16].mxu0 %vm679_vm7, %v636_v52 }
 0x132   :  { %1471 = vmatprep.mubr.msk.f32.mxu0 %vm679_vm7, %v637_v55 }
 0x133   :  { %v616_v59 = vsub.f32 %v594_v56, %v615_v57 }
 0x135   :  { %v617_v60 = vmul.f32 0.5, %v616_v59  ;;  %1472 = vmatmul.mubr.msk.f32.gmra.mrb[18].mxu0 %vm679_vm7, %v638_v58 }
 0x137   :  { %v2100_v61 = vadd.f32 %v617_v60, %v579_v38 }
 0x1fc   :  { %v1464_v3 = vpop.f32.mrb[12].mxu0 }
 0x1fd   :  { %v2106_v4 = vadd.f32 %v1464_v3, %v647_v1  ;;  %v770_v5 = vpop.f32.mrb[13].mxu0 }
 0x1fe   :  { %v2108_v6 = vadd.f32 %v770_v5, %v642_v63 }
 0x1ff   :  { %v818_v7 = vmul.f32 0.044715, %v2106_v4  ;;  %v810_v1 = vmul.f32 0.5, %v2106_v4 }
 0x200   :  { %v817_v8 = vmul.f32 0.044715, %v2108_v6  ;;  %v1467_v9 = vpop.f32.mrb[14].mxu0  ;;  %v809_v5 = vmul.f32 0.5, %v2108_v6 }
 0x201   :  { %v826_v10 = vmul.f32 %v818_v7, %v2106_v4  ;;  %v2113_v11 = vadd.f32 %v1467_v9, %v657_v2  ;;  %v780_v12 = vpop.f32.mrb[15].mxu0 }
 0x202   :  { %v825_v14 = vmul.f32 %v817_v8, %v2108_v6  ;;  %v2116_v15 = vadd.f32 %v780_v12, %v652_v0 }
 0x203   :  { %v834_v17 = vmul.f32 %v826_v10, %v2106_v4  ;;  %v820_v18 = vmul.f32 0.044715, %v2113_v11 }
 0x204   :  { %v833_v19 = vmul.f32 %v825_v14, %v2108_v6  ;;  %v819_v20 = vmul.f32 0.044715, %v2116_v15  ;;  %v1470_v21 = vpop.f32.mrb[16].mxu0 }
 0x205   :  { %v828_v22 = vmul.f32 %v820_v18, %v2113_v11  ;;  %v2123_v23 = vadd.f32 %v1470_v21, %v667_v13  ;;  %v790_v24 = vpop.f32.mrb[17].mxu0  ;;  %v842_v25 = vadd.f32 %v834_v17, %v2106_v4  ;;  %v812_v13 = vmul.f32 0.5, %v2113_v11 }
 0x206   :  { %v827_v26 = vmul.f32 %v819_v20, %v2116_v15  ;;  %v2127_v27 = vadd.f32 %v790_v24, %v662_v16  ;;  %v841_v28 = vadd.f32 %v833_v19, %v2108_v6  ;;  %v811_v17 = vmul.f32 0.5, %v2116_v15 }
 0x207   :  { %v836_v29 = vmul.f32 %v828_v22, %v2113_v11  ;;  %v822_v30 = vmul.f32 0.044715, %v2123_v23  ;;  %v850_v31 = vmul.f32 0.7978846, %v842_v25  ;;  %v814_v6 = vmul.f32 0.5, %v2123_v23 }
 0x208   :  { %v835_v33 = vmul.f32 %v827_v26, %v2116_v15  ;;  %v821_v34 = vmul.f32 0.044715, %v2127_v27  ;;  %v1473_v35 = vpop.f32.mrb[18].mxu0  ;;  %v849_v36 = vmul.f32 0.7978846, %v841_v28  ;;  %v813_v25 = vmul.f32 0.5, %v2127_v27 }
 0x209   :  { %v830_v38 = vmul.f32 %v822_v30, %v2123_v23  ;;  %v2135_v39 = vadd.f32 %v1473_v35, %v677_v32  ;;  %v800_v40 = vpop.f32.mrb[19].mxu0  ;;  %1629 = vtanh.f32 %v850_v31  ;;  %v844_v41 = vadd.f32 %v836_v29, %v2113_v11 }
 0x20a   :  { %v829_v42 = vmul.f32 %v821_v34, %v2127_v27  ;;  %v801_v43 = vadd.f32 %v800_v40, %v672_v37  ;;  %1631 = vtanh.f32 %v849_v36  ;;  %v843_v44 = vadd.f32 %v835_v33, %v2116_v15  ;;  %v891_v37 = vpop.permute.xlu1 %890 }
 0x20b   :  { %v838_v45 = vmul.f32 %v830_v38, %v2123_v23  ;;  %v824_v46 = vmul.f32 0.044715, %v2135_v39  ;;  %v852_v47 = vmul.f32 0.7978846, %v844_v41  ;;  %v816_v15 = vmul.f32 0.5, %v2135_v39 }
 0x20c   :  { %v837_v48 = vmul.f32 %v829_v42, %v2127_v27  ;;  %v823_v49 = vmul.f32 0.044715, %v801_v43  ;;  %v851_v50 = vmul.f32 0.7978846, %v843_v44  ;;  %v815_v33 = vmul.f32 0.5, %v801_v43 }
 0x20d   :  { %v832_v51 = vmul.f32 %v824_v46, %v2135_v39  ;;  %1633 = vtanh.f32 %v852_v47  ;;  %v846_v52 = vadd.f32 %v838_v45, %v2123_v23 }
 0x20e   :  { %v831_v53 = vmul.f32 %v823_v49, %v801_v43  ;;  %1635 = vtanh.f32 %v851_v50  ;;  %v845_v54 = vadd.f32 %v837_v48, %v2127_v27  ;;  %v882_v27 = vld [vmem:[%s2175_s3 + $0x8] sm:$0xff]  ;;  %s1682_s3 = smov [#allocation2]  }
 0x20f   :  { %v840_v55 = vmul.f32 %v832_v51, %v2135_v39  ;;  %v854_v56 = vmul.f32 0.7978846, %v846_v52  ;;  %s1032_s22 = sshll.u32 %s1682_s3, 4  ;;  %s1033_s22 = int_to_ptr.vmem [resolvable:$true] %s1032_s22 }
 0x210   :  { %v839_v57 = vmul.f32 %v831_v53, %v801_v43  ;;  %v853_v58 = vmul.f32 0.7978846, %v845_v54  ;;  %s1653_s23 = scalar_lea.vmem %s1033_s22, 16  ;;  %s1657_s24 = scalar_lea.vmem %s1033_s22, 32 }
 0x211   :  { %1637 = vtanh.f32 %v854_v56  ;;  %v848_v59 = vadd.f32 %v840_v55, %v2135_v39  ;;  %v886_v39 = vpop.permute.xlu0 %885  ;;  %p1654_p0 = scmp.ne.s32.totalorder %s1033_s22, %s1653_s23  ;;  %p1658_p1 = scmp.lt.s32.totalorder %s1033_s22, %s1033_s22 }
 0x212   :  { %1639 = vtanh.f32 %v853_v58  ;;  %v847_v60 = vadd.f32 %v839_v57, %v801_v43  ;;  %p1659_p2 = scmp.lt.s32.totalorder %s1657_s24, %s1653_s23 }
 0x213   :  { %v1630_v62 = vpop.eup %1629  ;;  %v856_v63 = vmul.f32 0.7978846, %v848_v59 }
 0x214   :  { %v1632_v0 = vpop.eup %1631  ;;  %v866_v2 = vadd.f32 1.0, %v1630_v62  ;;  %v855_v3 = vmul.f32 0.7978846, %v847_v60  ;;  %v1000_v60 = vpop.permute.xlu1 %999  ;;  %p1660_p3 = por %p1659_p2, %p1658_p1 }
 0x215   :  { %v865_v7 = vadd.f32 1.0, %v1632_v0  ;;  %1641 = vtanh.f32 %v856_v63  ;;  %v995_v63 = vpop.permute.xlu0 %994 }
 0x216   :  { %v874_v8 = vmul.f32 %v866_v2, %v810_v1  ;;  %1643 = vtanh.f32 %v855_v3  ;;  %p1661_p4 = pnand %p1660_p3, %p1654_p0 }
 0x217   :  { %v1634_v9 = vpop.eup %1633  ;;  %v873_v10 = vmul.f32 %v865_v7, %v809_v5 }
 0x218   :  { %v1636_v12 = vpop.eup %1635  ;;  %v868_v14 = vadd.f32 1.0, %v1634_v9 }
 0x219   :  { %v1605_v16 = vpack.c.bf16 %v874_v8, %v873_v10  ;;  %v867_v18 = vadd.f32 1.0, %v1636_v12 }
 0x21a   :  { %v876_v19 = vmul.f32 %v868_v14, %v812_v13  ;;  %v1016_v13 = vpop.permute.xlu0 %1015 }
 0x21b   :  { %v1638_v4 = vpop.eup %1637  ;;  %1606 = vmatprep.subr.bf16.mxu1 %v1605_v16  ;;  %v875_v20 = vmul.f32 %v867_v18, %v811_v17 }
 0x21c   :  { %v1640_v21 = vpop.eup %1639  ;;  %1608 = vmatpush3.bf16.msra.mxu1 %v1605_v16  ;;  %v870_v22 = vadd.f32 1.0, %v1638_v4 }
 0x21d   :  { %v1609_v24 = vpack.c.bf16 %v876_v19, %v875_v20  ;;  %v869_v26 = vadd.f32 1.0, %v1640_v21 }
 0x21e   :  { %v878_v28 = vmul.f32 %v870_v22, %v814_v6 }
 0x21f   :  { %v1642_v11 = vpop.eup %1641  ;;  %1610 = vmatprep.subr.bf16.mxu1 %v1609_v24  ;;  %v877_v29 = vmul.f32 %v869_v26, %v813_v25 }
 0x220   :  { %v1644_v30 = vpop.eup %1643  ;;  %1612 = vmatpush3.bf16.msra.mxu1 %v1609_v24  ;;  %v872_v31 = vadd.f32 1.0, %v1642_v11 }
 0x221   :  { %v1613_v32 = vpack.c.bf16 %v878_v28, %v877_v29  ;;  %v871_v34 = vadd.f32 1.0, %v1644_v30 }
 0x222   :  { %v880_v35 = vmul.f32 %v872_v31, %v816_v15 }
 0x223   :  { %1614 = vmatprep.subr.bf16.mxu1 %v1613_v32  ;;  %v879_v23 = vmul.f32 %v871_v34, %v815_v33 }
 0x224   :  { %1616 = vmatpush3.bf16.msra.mxu1 %v1613_v32 }
 0x225   :  { %v1617_v36 = vpack.c.bf16 %v880_v35, %v879_v23 }
 0x227   :  { %1618 = vmatprep.subr.bf16.mxu1 %v1617_v36 }
 0x228   :  { %1620 = vmatpush3.bf16.msra.mxu1 %v1617_v36 }
 0x22b   :  { %1491 = vmatmul.mubr.msk.f32.vlgmr.msra.gmra.mrb[12].mxu1 %vm679_vm7, %v882_v27 }
 0x2fe   :  { %v1492_v38 = vpop.f32.mrb[12].mxu1 }
 0x2ff   :  { %v971_v40 = vadd.f32 %v1492_v38, %v891_v37  ;;  %v965_v41 = vpop.f32.mrb[13].mxu1 }
 0x300   :  { %v966_v42 = vadd.f32 %v965_v41, %v886_v39 }
 0x301   :  { %v977_v43 = vmul.f32 0.044715, %v971_v40  ;;  %v975_v55 = vmul.f32 0.5, %v971_v40 }
 0x302   :  { %v976_v44 = vmul.f32 0.044715, %v966_v42  ;;  %v974_v57 = vmul.f32 0.5, %v966_v42 }
 0x303   :  { %v979_v45 = vmul.f32 %v977_v43, %v971_v40 }
 0x304   :  { %v978_v46 = vmul.f32 %v976_v44, %v966_v42 }
 0x305   :  { %v981_v47 = vmul.f32 %v979_v45, %v971_v40 }
 0x306   :  { %v980_v48 = vmul.f32 %v978_v46, %v966_v42 }
 0x307   :  { %v983_v49 = vadd.f32 %v981_v47, %v971_v40 }
 0x308   :  { %v982_v50 = vadd.f32 %v980_v48, %v966_v42 }
 0x309   :  { %v985_v51 = vmul.f32 0.7978846, %v983_v49 }
 0x30a   :  { %v984_v52 = vmul.f32 0.7978846, %v982_v50 }
 0x30b   :  { %1645 = vtanh.f32 %v985_v51 }
 0x30c   :  { %1647 = vtanh.f32 %v984_v52 }
 0x315   :  { %v1646_v53 = vpop.eup %1645 }
 0x316   :  { %v1648_v54 = vpop.eup %1647  ;;  %v989_v56 = vadd.f32 1.0, %v1646_v53 }
 0x317   :  { %v988_v58 = vadd.f32 1.0, %v1648_v54 }
 0x318   :  { %v991_v59 = vmul.f32 %v989_v56, %v975_v55 }
 0x319   :  { %v990_v62 = vmul.f32 %v988_v58, %v974_v57 }
 0x31a   :  { %v1003_v0 = vmul.f32 %v1000_v60, %v991_v59 }
 0x31b   :  { %v1002_v1 = vmul.f32 %v995_v63, %v990_v62 }
 0x31d   :  { %v1004_v2 = vadd.f32 %v1003_v0, %v1002_v1 }
 0x31f   :  { %v1005_v3 = vrot.slane %v1004_v2, 4 }
 0x321   :  { %v1006_v5 = vadd.f32 %v1005_v3, %v1004_v2 }
 0x323   :  { %v1007_v7 = vrot.slane %v1006_v5, 2 }
 0x325   :  { %v1008_v8 = vadd.f32 %v1007_v7, %v1006_v5 }
 0x327   :  { %v1009_v9 = vrot.slane %v1008_v8, 1 }
 0x329   :  { %v1010_v10 = vadd.f32 %v1009_v9, %v1008_v8 }
 0x32b   :  { %v1012_v12 = vadd.f32 %v2100_v61, %v1010_v10 }
 0x32d   :  { %v1018_v14 = vadd.f32 %v1016_v13, %v1012_v12 }
 0x32f   :  { %v1179_v16 = vmul.f32 -1.442695, %v1018_v14 }
 0x331   :  { %1649 = vpow2.f32 %v1179_v16 }
 0x33b   :  { %v1650_v17 = vpop.eup %1649 }
 0x33c   :  { %v1022_v18 = vadd.f32 1.0, %v1650_v17 }
 0x33e   :  { %1651 = vrcp.f32 %v1022_v18 }
 0x348   :  { %v1652_v19 = vpop.eup %1651 }
 0x349   :  { %1025 = vst [vmem:[#allocation2] sm:$0x1] %v1652_v19 }
 0x34a   :  { %1664 = shalt.err (!%p1661_p4)
}
 0x34b   :  { %s1665_s26 = scalar_lea.hbm %s2177_s5, 16 }
 0x34c   :  { %p1666_p5 = scmp.ne.s32.totalorder %s2177_s5, %s1665_s26  ;;  %p1669_p6 = scmp.lt.u32.totalorder %s1665_s26, %s2177_s5 }
 0x34e   :  { %p1671_p7 = pnand %p1669_p6, %p1666_p5 }
 0x350   :  { %1674 = shalt.err (!%p1671_p7)
}
 0x351   :  { %1035 = dma.vmem_to_hbm [thread:$0]  %s1033_s22, 16, %s2177_s5, [#allocation3]  }
 0x352   :  { %1675 = dma.done.wait [#allocation3], 16  }
 0x353   :  { %1676 = vsyncadd [#allocation3], 4294967280 }
 0x354   :  { %1039 = vsyncpa [#allocation3], 1 }

</bundles_post_ra>
